<compile_context>
chip_gen: v7x
topology: tpu7x:2x2x1
jax: 0.10.0
libtpu: 0.0.40
codegen_flags: <defaults>
</compile_context>

<pallas_src>
import math

import jax
import jax.numpy as jnp
from jax.experimental import pallas as pl
from jax.experimental.pallas import tpu as pltpu


# --------------------------------------------------------------------------
# Kernel
# --------------------------------------------------------------------------
def _combiner_kernel(f1_ref, f2_ref, f3_ref,
                     w1a_ref, w1b_ref, w1c_ref, b1_ref,
                     w2t_ref, b2_ref, wf_ref,
                     o_ref):
    # Feature slabs for this (batch, pixel-tile) grid point, (C, TN), already
    # in the MXU-operand dtype (bf16 by default) straight from HBM.
    x1 = f1_ref[0]
    x2 = f2_ref[0]
    x3 = f3_ref[0]

    # attention[0]: Conv2d(3C -> C, k=1) + bias, ReLU.
    # Concat-free: three accumulated matmuls with pre-split weight slabs,
    # f32 accumulation.
    h = jnp.dot(w1a_ref[...], x1, preferred_element_type=jnp.float32)
    h = h + jnp.dot(w1b_ref[...], x2, preferred_element_type=jnp.float32)
    h = h + jnp.dot(w1c_ref[...], x3, preferred_element_type=jnp.float32)
    h = jnp.maximum(h + b1_ref[...], 0.0)                      # (C, TN) f32

    # attention[2]: Conv2d(C -> 3, k=1) + bias.  Only 3 output rows, so keep
    # it off the MXU: per-row broadcast-mul + sublane reduce (VPU/XLU), f32.
    def score(i):
        w_col = w2t_ref[:, i:i + 1]                            # (C, 1) f32
        return (jnp.sum(h * w_col, axis=0, keepdims=True)
                + b2_ref[:, i:i + 1])                          # (1, TN) f32

    s0 = score(0)
    s1 = score(1)
    s2 = score(2)

    # Softmax over the 3 attention channels, explicit rows (pure VPU/EUP, no
    # cross-lane reduce).  Exact reciprocal: approx vrcp is not accurate
    # enough to match torch softmax at tight tolerances.
    m = jnp.maximum(s0, jnp.maximum(s1, s2))
    e0 = jnp.exp(s0 - m)
    e1 = jnp.exp(s1 - m)
    e2 = jnp.exp(s2 - m)
    inv = pl.reciprocal(e0 + e1 + e2)                          # (1, TN) f32

    # Weighted combination; bf16 features are upcast on the fly (no (C, TN)
    # cast temporaries), all elementwise math in f32.
    comb = (e0 * inv) * x1 + (e1 * inv) * x2 + (e2 * inv) * x3  # (C, TN) f32

    # final_conv: Conv2d(C -> 64, k=1, bias=False).  Lane-dense NCHW store.
    out = jnp.dot(wf_ref[...], comb.astype(wf_ref.dtype),
                  preferred_element_type=jnp.float32)
    o_ref[0] = out.astype(o_ref.dtype)


# --------------------------------------------------------------------------
# Tile / VMEM sizing helpers
# --------------------------------------------------------------------------
def _vmem_capacity_bytes():
    """Generation-aware VMEM capacity (v5e/v6e: 128 MiB, v7x: 64 MiB/TC)."""
    try:
        cap = getattr(pltpu.get_tpu_info(), "vmem_capacity_bytes", None)
        if cap:
            return int(cap)
    except Exception:
        pass
    return 64 * 1024 * 1024            # conservative default (v7x per-core)


def _pick_tn(hw, per_col_bytes, budget_bytes, batch):
    """Pixel-tile width.

    Prefers a multiple of 128 that divides H*W exactly (so the wrapper never
    pads the inputs or slices the output -> no extra HBM copies), as large as
    the VMEM budget allows, but small enough that B * n_tiles >= 4 when
    possible (keeps both v7x TensorCores busy).  Returns (tn, needs_pad).
    """
    cap = (budget_bytes // max(per_col_bytes, 1)) // 128 * 128
    cap = int(max(128, min(cap, 32768)))
    divs = [t for t in range(128, min(hw, cap) + 1, 128) if hw % t == 0]
    if not divs:
        # Small or awkward H*W: single full-extent tile if it fits, otherwise
        # fall back (rare) to padding the pixel axis.
        return (hw, False) if hw <= cap else (cap, True)
    for min_steps in (4, 2, 1):
        ok = [t for t in divs if batch * (hw // t) >= min_steps]
        if ok:
            return (max(ok), False)
    return (max(divs), False)


# --------------------------------------------------------------------------
# Wrapper
# --------------------------------------------------------------------------
def adaptive_combiner_pallas(f1, f2, f3, params, *, tn=None,
                             compute_dtype=jnp.bfloat16, out_dtype=None):
    """AdaptiveCombiner forward.  f1, f2, f3: (B, C, H, W) NCHW (like PyTorch).

    compute_dtype: MXU-operand / feature HBM-stream dtype (bf16 default;
      accumulation, biases and softmax stay f32).
    out_dtype: HBM output dtype; defaults to compute_dtype.
    """
    B, C, H, W = f1.shape
    assert f2.shape == f1.shape and f3.shape == f1.shape
    HW = H * W
    w1, b1, w2, b2, wf = params          # (C,3C), (C,), (3,C), (3,), (64,C)
    OC = wf.shape[0]
    cd = jnp.dtype(compute_dtype)
    od = jnp.dtype(out_dtype) if out_dtype is not None else cd

    # Generation-aware sizing.
    vmem_cap = _vmem_capacity_bytes()
    per_col = (2 * 3 * C * cd.itemsize       # 3 double-buffered input streams
               + 2 * OC * od.itemsize        # double-buffered output stream
               + 4 * (3 * C + OC + 16))      # live f32 intermediates + headroom
    if tn is None:
        tn, needs_pad = _pick_tn(HW, per_col, int(0.35 * vmem_cap), B)
    else:
        needs_pad = (HW % tn) != 0
    n_tiles = pl.cdiv(HW, tn)
    HWp = n_tiles * tn

    def prep(x):
        # NCHW -> (B, C, H*W): pure reshape (pixels land on the lane axis);
        # cast here so the pallas_call reads compute_dtype from HBM.
        x = x.reshape(B, C, HW).astype(cd)
        if needs_pad:                        # rare fallback only
            x = jnp.pad(x, ((0, 0), (0, 0), (0, HWp - HW)))
        return x

    f1r, f2r, f3r = prep(f1), prep(f2), prep(f3)

    # Weights stay in PyTorch (out, in) orientation.  conv1 is pre-split so
    # the kernel never builds a (3C, TN) concat; w2 is passed transposed
    # (C, 3) so the 3-row score conv runs on the VPU/XLU instead of the MXU.
    w1a = w1[:, 0 * C:1 * C].astype(cd)
    w1b = w1[:, 1 * C:2 * C].astype(cd)
    w1c = w1[:, 2 * C:3 * C].astype(cd)
    b1c = b1.reshape(C, 1).astype(jnp.float32)
    w2t = w2.T.astype(jnp.float32)           # (C, 3)
    b2c = b2.reshape(1, 3).astype(jnp.float32)
    wfc = wf.astype(cd)                      # (OC, C)
    # NOTE: if a real model's C is not a multiple of the sublane pack
    # (8 for f32 / 16 for bf16 operands), pad C once here (features + weight
    # slabs) to avoid ragged vregs on every op.

    feat_spec = pl.BlockSpec((1, C, tn), lambda b, j: (b, 0, j))
    const2d = lambda arr: pl.BlockSpec(arr.shape, lambda b, j: (0, 0))

    w_bytes = sum(int(a.size) * a.dtype.itemsize
                  for a in (w1a, w1b, w1c, b1c, w2t, b2c, wfc))
    need = 2 * w_bytes + per_col * tn + (8 << 20)
    vmem_limit = int(min(max(need, 32 << 20), 0.6 * vmem_cap))

    out = pl.pallas_call(
        _combiner_kernel,
        out_shape=jax.ShapeDtypeStruct((B, OC, HWp), od),
        grid_spec=pltpu.PrefetchScalarGridSpec(
            num_scalar_prefetch=0,
            grid=(B, n_tiles),
            in_specs=[feat_spec, feat_spec, feat_spec,
                      const2d(w1a), const2d(w1b), const2d(w1c),
                      const2d(b1c), const2d(w2t), const2d(b2c),
                      const2d(wfc)],
            out_specs=pl.BlockSpec((1, OC, tn), lambda b, j: (b, 0, j)),
        ),
        compiler_params=pltpu.CompilerParams(
            dimension_semantics=("parallel", "parallel"),
            vmem_limit_bytes=vmem_limit),
    )(f1r, f2r, f3r, w1a, w1b, w1c, b1c, w2t, b2c, wfc)

    if needs_pad:
        out = out[:, :, :HW]
    return out.reshape(B, OC, H, W)          # already NCHW, no transpose


# --------------------------------------------------------------------------
# Params (PyTorch-style (out, in) weights) and plain-JAX reference
# --------------------------------------------------------------------------
def init_params(key, in_channels, out_channels=64):
    """Deterministic synthetic init; shapes follow AdaptiveCombiner.__init__."""
    C = in_channels
    k1, k2, k3, k4, k5 = jax.random.split(key, 5)

    def u(k, shape, fan_in):
        bound = 1.0 / math.sqrt(fan_in)
        return jax.random.uniform(k, shape, jnp.float32, -bound, bound)

    w1 = u(k1, (C, 3 * C), 3 * C)         # attention[0].weight (out, in)
    b1 = u(k2, (C,), 3 * C)               # attention[0].bias
    w2 = u(k3, (3, C), C)                 # attention[2].weight
    b2 = u(k4, (3,), C)                   # attention[2].bias
    wf = u(k5, (out_channels, C), C)      # final_conv.weight (no bias)
    return w1, b1, w2, b2, wf


def reference_jax(f1, f2, f3, params):
    """Plain-JAX reference mirroring the PyTorch forward (NCHW, 1x1 convs).

    Uses precision='highest' so the reference itself is not degraded by the
    TPU's default bf16-pass matmul precision.
    """
    w1, b1, w2, b2, wf = params
    xc = jnp.concatenate([f1, f2, f3], axis=1)
    h = jnp.einsum('oi,bihw->bohw', w1, xc,
                   precision='highest') + b1[None, :, None, None]
    h = jnp.maximum(h, 0.0)
    s = jnp.einsum('oi,bihw->bohw', w2, h,
                   precision='highest') + b2[None, :, None, None]
    p = jax.nn.softmax(s, axis=1)
    comb = p[:, 0:1] * f1 + p[:, 1:2] * f2 + p[:, 2:3] * f3
    return jnp.einsum('oi,bihw->bohw', wf, comb, precision='highest')


# --------------------------------------------------------------------------
if __name__ == "__main__":
    key = jax.random.PRNGKey(0)
    kf1, kf2, kf3, kp = jax.random.split(key, 4)

    B, C, H, W = 2, 4, 16, 16
    f1 = jax.random.normal(kf1, (B, C, H, W), jnp.float32)
    f2 = jax.random.normal(kf2, (B, C, H, W), jnp.float32)
    f3 = jax.random.normal(kf3, (B, C, H, W), jnp.float32)
    params = init_params(kp, C)

    ref = reference_jax(f1, f2, f3, params)

    def max_rel_err(a, b):
        a = a.astype(jnp.float32)
        return float(jnp.max(jnp.abs(a - b)) / (jnp.max(jnp.abs(b)) + 1e-12))

    # f32 MXU-operand path (exact softmax reciprocal, f32 throughout).
    out_f32 = adaptive_combiner_pallas(f1, f2, f3, params,
                                       compute_dtype=jnp.float32,
                                       out_dtype=jnp.float32)
    out_f32 = jax.block_until_ready(out_f32)
    assert out_f32.shape == (B, 64, H, W)
    err32 = max_rel_err(out_f32, ref)
    assert err32 < 3e-2, f"f32 path rel err {err32}"

    # Default path: bf16 HBM feature streams + bf16 MXU operands, f32
    # accumulate/softmax, bf16 output.
    out_bf16 = adaptive_combiner_pallas(f1, f2, f3, params)
    out_bf16 = jax.block_until_ready(out_bf16)
    assert out_bf16.shape == (B, 64, H, W)
    assert out_bf16.dtype == jnp.bfloat16
    errbf = max_rel_err(out_bf16, ref)
    assert errbf < 7e-2, f"bf16 path rel err {errbf}"

    print("KERNEL_OK")
</pallas_src>

<mosaic_0001>
module attributes {stable_mosaic.version = 11 : i64} {
  func.func @_combiner_kernel(%arg0: i32, %arg1: i32, %arg2: memref<1x4x128xf32, #tpu.memory_space<vmem>>, %arg3: memref<1x4x128xf32, #tpu.memory_space<vmem>>, %arg4: memref<1x4x128xf32, #tpu.memory_space<vmem>>, %arg5: memref<4x4xf32, #tpu.memory_space<vmem>>, %arg6: memref<4x4xf32, #tpu.memory_space<vmem>>, %arg7: memref<4x4xf32, #tpu.memory_space<vmem>>, %arg8: memref<4x1xf32, #tpu.memory_space<vmem>>, %arg9: memref<4x3xf32, #tpu.memory_space<vmem>>, %arg10: memref<1x3xf32, #tpu.memory_space<vmem>>, %arg11: memref<64x4xf32, #tpu.memory_space<vmem>>, %arg12: memref<1x64x128xf32, #tpu.memory_space<vmem>>) attributes {dimension_semantics = [#tpu.dimension_semantics<parallel>, #tpu.dimension_semantics<parallel>], iteration_bounds = array<i64: 2, 2>, scalar_prefetch = 0 : i64, scratch_operands = 0 : i64, tpu.core_type = #tpu.core_type<tc>, window_params = [{transform_indices = @transform_0, window_bounds = array<i64: 1, 4, 128>}, {transform_indices = @transform_1, window_bounds = array<i64: 1, 4, 128>}, {transform_indices = @transform_2, window_bounds = array<i64: 1, 4, 128>}, {pipeline_mode = #tpu.pipeline_mode<synchronous>, transform_indices = @transform_3, window_bounds = array<i64: 4, 4>}, {pipeline_mode = #tpu.pipeline_mode<synchronous>, transform_indices = @transform_4, window_bounds = array<i64: 4, 4>}, {pipeline_mode = #tpu.pipeline_mode<synchronous>, transform_indices = @transform_5, window_bounds = array<i64: 4, 4>}, {pipeline_mode = #tpu.pipeline_mode<synchronous>, transform_indices = @transform_6, window_bounds = array<i64: 4, 1>}, {pipeline_mode = #tpu.pipeline_mode<synchronous>, transform_indices = @transform_7, window_bounds = array<i64: 4, 3>}, {pipeline_mode = #tpu.pipeline_mode<synchronous>, transform_indices = @transform_8, window_bounds = array<i64: 1, 3>}, {pipeline_mode = #tpu.pipeline_mode<synchronous>, transform_indices = @transform_9, window_bounds = array<i64: 64, 4>}, {transform_indices = @transform_10, window_bounds = array<i64: 1, 64, 128>}]} {
    %c0 = arith.constant 0 : index
    %c0_0 = arith.constant 0 : index
    %c0_1 = arith.constant 0 : index
    %0 = vector.load %arg2[%c0, %c0_0, %c0_1] : memref<1x4x128xf32, #tpu.memory_space<vmem>>, vector<1x4x128xf32>
    %1 = vector.shape_cast %0 : vector<1x4x128xf32> to vector<4x128xf32>
    %c0_2 = arith.constant 0 : index
    %c0_3 = arith.constant 0 : index
    %c0_4 = arith.constant 0 : index
    %2 = vector.load %arg3[%c0_2, %c0_3, %c0_4] : memref<1x4x128xf32, #tpu.memory_space<vmem>>, vector<1x4x128xf32>
    %3 = vector.shape_cast %2 : vector<1x4x128xf32> to vector<4x128xf32>
    %c0_5 = arith.constant 0 : index
    %c0_6 = arith.constant 0 : index
    %c0_7 = arith.constant 0 : index
    %4 = vector.load %arg4[%c0_5, %c0_6, %c0_7] : memref<1x4x128xf32, #tpu.memory_space<vmem>>, vector<1x4x128xf32>
    %5 = vector.shape_cast %4 : vector<1x4x128xf32> to vector<4x128xf32>
    %c0_8 = arith.constant 0 : index
    %c0_9 = arith.constant 0 : index
    %6 = vector.load %arg5[%c0_8, %c0_9] : memref<4x4xf32, #tpu.memory_space<vmem>>, vector<4x4xf32>
    %cst = arith.constant dense<0.000000e+00> : vector<4x128xf32>
    %7 = tpu.matmul %6, %1, %cst {dimension_numbers = #tpu.dot_dimension_numbers<[1], [0], [0], [1], [0, 0, 1, 1], [], []>} : vector<4x4xf32>, vector<4x128xf32>, vector<4x128xf32> -> vector<4x128xf32>
    %c0_10 = arith.constant 0 : index
    %c0_11 = arith.constant 0 : index
    %8 = vector.load %arg6[%c0_10, %c0_11] : memref<4x4xf32, #tpu.memory_space<vmem>>, vector<4x4xf32>
    %cst_12 = arith.constant dense<0.000000e+00> : vector<4x128xf32>
    %9 = tpu.matmul %8, %3, %cst_12 {dimension_numbers = #tpu.dot_dimension_numbers<[1], [0], [0], [1], [0, 0, 1, 1], [], []>} : vector<4x4xf32>, vector<4x128xf32>, vector<4x128xf32> -> vector<4x128xf32>
    %10 = arith.addf %7, %9 : vector<4x128xf32>
    %c0_13 = arith.constant 0 : index
    %c0_14 = arith.constant 0 : index
    %11 = vector.load %arg7[%c0_13, %c0_14] : memref<4x4xf32, #tpu.memory_space<vmem>>, vector<4x4xf32>
    %cst_15 = arith.constant dense<0.000000e+00> : vector<4x128xf32>
    %12 = tpu.matmul %11, %5, %cst_15 {dimension_numbers = #tpu.dot_dimension_numbers<[1], [0], [0], [1], [0, 0, 1, 1], [], []>} : vector<4x4xf32>, vector<4x128xf32>, vector<4x128xf32> -> vector<4x128xf32>
    %13 = arith.addf %10, %12 : vector<4x128xf32>
    %c0_16 = arith.constant 0 : index
    %c0_17 = arith.constant 0 : index
    %14 = vector.load %arg8[%c0_16, %c0_17] : memref<4x1xf32, #tpu.memory_space<vmem>>, vector<4x1xf32>
    %15 = vector.broadcast %14 : vector<4x1xf32> to vector<4x128xf32>
    %16 = arith.addf %13, %15 : vector<4x128xf32>
    %cst_18 = arith.constant 0.000000e+00 : f32
    %17 = vector.broadcast %cst_18 : f32 to vector<4x128xf32>
    %18 = arith.maximumf %16, %17 : vector<4x128xf32>
    %c0_19 = arith.constant 0 : index
    %c0_20 = arith.constant 0 : index
    %19 = vector.load %arg9[%c0_19, %c0_20] : memref<4x3xf32, #tpu.memory_space<vmem>>, vector<4x1xf32>
    %20 = vector.broadcast %19 : vector<4x1xf32> to vector<4x128xf32>
    %21 = arith.mulf %18, %20 : vector<4x128xf32>
    %cst_21 = arith.constant dense<0.000000e+00> : vector<128xf32>
    %22 = vector.multi_reduction <add>, %21, %cst_21 [0] : vector<4x128xf32> to vector<128xf32>
    %23 = vector.shape_cast %22 : vector<128xf32> to vector<1x128xf32>
    %c0_22 = arith.constant 0 : index
    %c0_23 = arith.constant 0 : index
    %24 = vector.load %arg10[%c0_22, %c0_23] : memref<1x3xf32, #tpu.memory_space<vmem>>, vector<1x1xf32>
    %25 = vector.broadcast %24 : vector<1x1xf32> to vector<1x128xf32>
    %26 = arith.addf %23, %25 : vector<1x128xf32>
    %c0_24 = arith.constant 0 : index
    %c1 = arith.constant 1 : index
    %27 = vector.load %arg9[%c0_24, %c1] : memref<4x3xf32, #tpu.memory_space<vmem>>, vector<4x1xf32>
    %28 = vector.broadcast %27 : vector<4x1xf32> to vector<4x128xf32>
    %29 = arith.mulf %18, %28 : vector<4x128xf32>
    %cst_25 = arith.constant dense<0.000000e+00> : vector<128xf32>
    %30 = vector.multi_reduction <add>, %29, %cst_25 [0] : vector<4x128xf32> to vector<128xf32>
    %31 = vector.shape_cast %30 : vector<128xf32> to vector<1x128xf32>
    %c0_26 = arith.constant 0 : index
    %c1_27 = arith.constant 1 : index
    %32 = vector.load %arg10[%c0_26, %c1_27] : memref<1x3xf32, #tpu.memory_space<vmem>>, vector<1x1xf32>
    %33 = vector.broadcast %32 : vector<1x1xf32> to vector<1x128xf32>
    %34 = arith.addf %31, %33 : vector<1x128xf32>
    %c0_28 = arith.constant 0 : index
    %c2 = arith.constant 2 : index
    %35 = vector.load %arg9[%c0_28, %c2] : memref<4x3xf32, #tpu.memory_space<vmem>>, vector<4x1xf32>
    %36 = vector.broadcast %35 : vector<4x1xf32> to vector<4x128xf32>
    %37 = arith.mulf %18, %36 : vector<4x128xf32>
    %cst_29 = arith.constant dense<0.000000e+00> : vector<128xf32>
    %38 = vector.multi_reduction <add>, %37, %cst_29 [0] : vector<4x128xf32> to vector<128xf32>
    %39 = vector.shape_cast %38 : vector<128xf32> to vector<1x128xf32>
    %c0_30 = arith.constant 0 : index
    %c2_31 = arith.constant 2 : index
    %40 = vector.load %arg10[%c0_30, %c2_31] : memref<1x3xf32, #tpu.memory_space<vmem>>, vector<1x1xf32>
    %41 = vector.broadcast %40 : vector<1x1xf32> to vector<1x128xf32>
    %42 = arith.addf %39, %41 : vector<1x128xf32>
    %43 = arith.maximumf %34, %42 : vector<1x128xf32>
    %44 = arith.maximumf %26, %43 : vector<1x128xf32>
    %45 = arith.subf %26, %44 : vector<1x128xf32>
    %46 = math.exp %45 : vector<1x128xf32>
    %47 = arith.subf %34, %44 : vector<1x128xf32>
    %48 = math.exp %47 : vector<1x128xf32>
    %49 = arith.subf %42, %44 : vector<1x128xf32>
    %50 = math.exp %49 : vector<1x128xf32>
    %51 = arith.addf %46, %48 : vector<1x128xf32>
    %52 = arith.addf %51, %50 : vector<1x128xf32>
    %53 = tpu.reciprocal %52 : vector<1x128xf32> -> vector<1x128xf32>
    %54 = arith.mulf %46, %53 : vector<1x128xf32>
    %55 = vector.broadcast %54 : vector<1x128xf32> to vector<4x128xf32>
    %56 = arith.mulf %55, %1 : vector<4x128xf32>
    %57 = arith.mulf %48, %53 : vector<1x128xf32>
    %58 = vector.broadcast %57 : vector<1x128xf32> to vector<4x128xf32>
    %59 = arith.mulf %58, %3 : vector<4x128xf32>
    %60 = arith.addf %56, %59 : vector<4x128xf32>
    %61 = arith.mulf %50, %53 : vector<1x128xf32>
    %62 = vector.broadcast %61 : vector<1x128xf32> to vector<4x128xf32>
    %63 = arith.mulf %62, %5 : vector<4x128xf32>
    %64 = arith.addf %60, %63 : vector<4x128xf32>
    %c0_32 = arith.constant 0 : index
    %c0_33 = arith.constant 0 : index
    %65 = vector.load %arg11[%c0_32, %c0_33] : memref<64x4xf32, #tpu.memory_space<vmem>>, vector<64x4xf32>
    %cst_34 = arith.constant dense<0.000000e+00> : vector<64x128xf32>
    %66 = tpu.matmul %65, %64, %cst_34 {dimension_numbers = #tpu.dot_dimension_numbers<[1], [0], [0], [1], [0, 0, 1, 1], [], []>} : vector<64x4xf32>, vector<4x128xf32>, vector<64x128xf32> -> vector<64x128xf32>
    %c0_35 = arith.constant 0 : index
    %c0_36 = arith.constant 0 : index
    %c0_37 = arith.constant 0 : index
    %67 = vector.load %arg12[%c0_35, %c0_36, %c0_37] : memref<1x64x128xf32, #tpu.memory_space<vmem>>, vector<1x64x128xf32>
    %68 = vector.shape_cast %67 : vector<1x64x128xf32> to vector<64x128xf32>
    %69 = vector.shape_cast %66 : vector<64x128xf32> to vector<1x64x128xf32>
    tpu.vector_store %arg12[%c0_35, %c0_36, %c0_37], %69 {strides = array<i32>} : memref<1x64x128xf32, #tpu.memory_space<vmem>>, vector<1x64x128xf32>,
    return
  }
  func.func @transform_0(%arg0: i32, %arg1: i32) -> (i32, i32, i32) {
    %c0_i32 = arith.constant 0 : i32
    %c0_i32_0 = arith.constant 0 : i32
    return %arg0, %c0_i32, %arg1 : i32, i32, i32
  }
  func.func @transform_1(%arg0: i32, %arg1: i32) -> (i32, i32, i32) {
    %c0_i32 = arith.constant 0 : i32
    %c0_i32_0 = arith.constant 0 : i32
    return %arg0, %c0_i32, %arg1 : i32, i32, i32
  }
  func.func @transform_2(%arg0: i32, %arg1: i32) -> (i32, i32, i32) {
    %c0_i32 = arith.constant 0 : i32
    %c0_i32_0 = arith.constant 0 : i32
    return %arg0, %c0_i32, %arg1 : i32, i32, i32
  }
  func.func @transform_3(%arg0: i32, %arg1: i32) -> (i32, i32) {
    %c0_i32 = arith.constant 0 : i32
    %c0_i32_0 = arith.constant 0 : i32
    %c0_i32_1 = arith.constant 0 : i32
    return %c0_i32, %c0_i32_0 : i32, i32
  }
  func.func @transform_4(%arg0: i32, %arg1: i32) -> (i32, i32) {
    %c0_i32 = arith.constant 0 : i32
    %c0_i32_0 = arith.constant 0 : i32
    %c0_i32_1 = arith.constant 0 : i32
    return %c0_i32, %c0_i32_0 : i32, i32
  }
  func.func @transform_5(%arg0: i32, %arg1: i32) -> (i32, i32) {
    %c0_i32 = arith.constant 0 : i32
    %c0_i32_0 = arith.constant 0 : i32
    %c0_i32_1 = arith.constant 0 : i32
    return %c0_i32, %c0_i32_0 : i32, i32
  }
  func.func @transform_6(%arg0: i32, %arg1: i32) -> (i32, i32) {
    %c0_i32 = arith.constant 0 : i32
    %c0_i32_0 = arith.constant 0 : i32
    %c0_i32_1 = arith.constant 0 : i32
    return %c0_i32, %c0_i32_0 : i32, i32
  }
  func.func @transform_7(%arg0: i32, %arg1: i32) -> (i32, i32) {
    %c0_i32 = arith.constant 0 : i32
    %c0_i32_0 = arith.constant 0 : i32
    %c0_i32_1 = arith.constant 0 : i32
    return %c0_i32, %c0_i32_0 : i32, i32
  }
  func.func @transform_8(%arg0: i32, %arg1: i32) -> (i32, i32) {
    %c0_i32 = arith.constant 0 : i32
    %c0_i32_0 = arith.constant 0 : i32
    %c0_i32_1 = arith.constant 0 : i32
    return %c0_i32, %c0_i32_0 : i32, i32
  }
  func.func @transform_9(%arg0: i32, %arg1: i32) -> (i32, i32) {
    %c0_i32 = arith.constant 0 : i32
    %c0_i32_0 = arith.constant 0 : i32
    %c0_i32_1 = arith.constant 0 : i32
    return %c0_i32, %c0_i32_0 : i32, i32
  }
  func.func @transform_10(%arg0: i32, %arg1: i32) -> (i32, i32, i32) {
    %c0_i32 = arith.constant 0 : i32
    %c0_i32_0 = arith.constant 0 : i32
    return %arg0, %c0_i32, %arg1 : i32, i32, i32
  }
}

</mosaic_0001>

<bundles_post_ra>
// kernel: tpu_custom_call.1
= control target key start
LH: loop header
LB: loop body
LE: loop exit
PB: predicated region body
PF: predicated region fallthrough
CT: control target
= control target key end

     0   :  { %s1611_s0 = inlined_call_operand.vmem [shape: f32[2,4,256], index: 0, kind: input, shape index: {}]   ;;  %s1612_s1 = inlined_call_operand.vmem [shape: f32[2,4,256], index: 1, kind: input, shape index: {}]   ;;  %s1613_s2 = inlined_call_operand.vmem [shape: f32[2,4,256], index: 2, kind: input, shape index: {}]   ;;  %s1614_s3 = inlined_call_operand.vmem [shape: f32[4,4], index: 3, kind: input, shape index: {}]   ;;  %s1615_s4 = inlined_call_operand.vmem [shape: f32[4,4], index: 4, kind: input, shape index: {}]   ;;  %s1616_s5 = inlined_call_operand.vmem [shape: f32[4,4], index: 5, kind: input, shape index: {}]   ;;  %s1617_s6 = inlined_call_operand.vmem [shape: f32[4,1], index: 6, kind: input, shape index: {}]   ;;  %s1618_s7 = inlined_call_operand.vmem [shape: f32[4,3], index: 7, kind: input, shape index: {}]   ;;  %s1619_s8 = inlined_call_operand.vmem [shape: f32[1,3], index: 8, kind: input, shape index: {}]   ;;  %s1620_s9 = inlined_call_operand.vmem [shape: f32[64,4], index: 9, kind: input, shape index: {}]   ;;  %s1621_s10 = inlined_call_operand.hbm [shape: f32[2,64,256], index: 10, kind: output, shape index: {}]  }
   0x1   :  { %1627 = sst [smem:[#allocation11_spill]] %s1618_s7 }
   0x2   :  { %15 = vsyncpa [#allocation3], 0 }
   0x3   :  { %17 = vsyncpa [#allocation3 + $0x1], 0  ;;  %s1389_s13 = smov 0   ;;  %s1391_s14 = smov 0  }
   0x4   :  { %s1393_s15 = smov 0   ;;  %s1395_s16 = smov 0  }
   0x5   :  { %s1397_s17 = smov 0   ;;  %s1399_s18 = smov 0  }
   0x6   :  { %s1401_s19 = smov 0   ;;  %s1403_s20 = smov 0  }
   0x7 LB: > { %1628 = sst [smem:[#allocation5_spill]] %s1303_s15  ;;  %s1059_s21 = sadd.s32 4294967295, %s1323_s20   ;;  %s1323_s20 = sphi %s1403_s20, %s23_s20   ;;  %s1319_s19 = sphi %s1401_s19, %s1642_s19   ;;  %s1315_s18 = sphi %s1399_s18, %s1641_s18   ;;  %s1311_s17 = sphi %s1397_s17, %s1640_s17   ;;  %s1307_s16 = sphi %s1395_s16, %s1639_s16   ;;  %s1303_s15 = sphi %s1393_s15, %s1638_s15   ;;  %s1299_s14 = sphi %s1391_s14, %s1644_s14   ;;  %s1295_s13 = sphi %s1389_s13, %s1643_s13  }
   0x8   : > { %1629 = sst [smem:[#allocation6_spill]] %s1315_s18  ;;  %s1060_s22 = sadd.s32 4294967294, %s1323_s20  }
   0x9   : > { %1630 = sst [smem:[#allocation7_spill]] %s1319_s19  ;;  %s32_s23 = sadd.s32 1, %s1315_s18 }
   0xa   : > { %p33_p0 = scmp.ge.s32.totalorder %s32_s23, 2  ;;  %s35_s24 = sadd.s32 1, %s1319_s19 }
   0xb   : > { %p285_p1 = scmp.ne.s32.totalorder %s1303_s15, %s1299_s14  ;;  %p286_p2 = scmp.eq.s32.totalorder %s1059_s21, 3 }
   0xc   : > { %s1646_s23 = smov (%p33_p0, %s32_s23), 0  ;;  %s1648_s24 = smov (!%p33_p0, %s35_s24), %s1319_s19 }
   0xd   : > { %1631 = sst [smem:[#allocation8_spill]] %s1646_s23  ;;  %s271_s25 = ssub.s32 %s1315_s18, %s1646_s23 }
   0xe   : > { %p1440_p3 = por %p286_p2, %p285_p1  ;;  %p37_p4 = scmp.ge.s32.totalorder %s1648_s24, 2 }
   0xf   : > { %p291_p5 = scmp.ne.s32.totalorder %s1299_s14, %s1295_s13  ;;  %p292_p6 = scmp.eq.s32.totalorder %s1060_s22, 3 }
  0x10   : > { %p1063_p7 = scmp.ge.s32.totalorder %s1323_s20, 1  ;;  %s1650_s24 = smov (%p37_p4, %s1648_s24), 0 }
  0x11   : > { %1633 = sst [smem:[#allocation9_spill]] %s1650_s24  ;;  %p1449_p8 = por %p292_p6, %p291_p5 }
  0x12   : > { %p364_p9 = scmp.lt.s32.totalorder %s1323_s20, 5  ;;  %s270_s28 = ssub.s32 %s1319_s19, %s1650_s24 }
  0x13   : > { %s275_s29 = sadd.s32 1, %s1303_s15  ;;  %s272_s30 = sor.u32 %s271_s25, %s270_s28 }
  0x14   : > { %p365_p10 = pnand %p1063_p7, %p364_p9  ;;  %p273_p11 = scmp.eq.s32.totalorder %s272_s30, 0 }
  0x15   : > { %p421_p12 = scmp.lt.s32.totalorder (!%p365_p10), %s1311_s17, 1  ;;  %p423_p13 = scmp.lt.s32.totalorder (!%p365_p10), %s1307_s16, 1  ;;  %v1325_v0 = vmov (!%p365_p10), 0.0   ;;  %vm1326_vm0 = vmmov (!%p365_p10), 0   ;;  %v1327_v2 = vmov (!%p365_p10), 2   ;;  %v1328_v3 = vmov (!%p365_p10), 0  }
  0x16   : > { %s1458_s11 = scalar_select %p273_p11, %s1303_s15, %s275_s29  }
  0x17   : > { %368 = sbr.rel (%p365_p10) target bundleno = 567 (0x237), region = 60  ;;  %1106 = vmatprep.subr.mxu0 (!%p365_p10), %v1325_v0  ;;  %1108 = vmatprep.mubr.msk.f32.mxu0 (!%p365_p10), %vm1326_vm0, %v1325_v0  ;;  %s1636_s7 = sld [smem:[#allocation11_spill]] (!%p365_p10)  ;;  %v682_v4 = vld [vmem:[%s1617_s6] sm:$0xf] (!%p365_p10)  ;;  %vm454_vm1 = vcmask (!%p365_p10), 1043456   ;;  %vm450_vm2 = vcmask (!%p365_p10), 31744   ;;  %v710_v31 = vlaneseq (!%p365_p10) }
  0x18   : > { %1635 = sst [smem:[#allocation10_spill]] %s1458_s11  ;;  %1216 = vset.pattern.permute.xlu1 (!%p365_p10), %v1327_v2  ;;  %1214 = vset.pattern.permute.xlu0 (!%p365_p10), %v1328_v3  ;;  %v449_v5 = vld [vmem:[%s1615_s4] sm:$0xf] (!%p365_p10)  ;;  %v1329_v8 = vmov (!%p365_p10), 1   ;;  %s1087_s18 = sshll.u32 (!%p365_p10), %s1311_s17, 4 }
  0x19   : > { %685 = vperm.xlu0 (!%p365_p10), %1214, %v682_v4   ;;  %v448_v9 = vld [vmem:[%s1614_s3] sm:$0xf] (!%p365_p10)  ;;  %v711_v38 = vshrl.u32 (!%p365_p10), %v710_v31, 7  ;;  %s939_s19 = sadd.s32 (!%p365_p10), %s1307_s16, %s1087_s18 }
  0x1a   : > { %v704_v10 = vld [vmem:[%s1619_s8] sm:$0x1] (!%p365_p10)  ;;  %s1088_s15 = sshll.u32 (!%p365_p10), %s939_s19, 7 }
  0x1b   : > { %v604_v12 = vld [vmem:[%s1616_s5] sm:$0xf] (!%p365_p10)  ;;  %v712_v46 = vsub.s32 (!%p365_p10), 0, %v711_v38 }
  0x1c   : > { %v779_v13 = vld [vmem:[%s1620_s9] sm:$0xff] (!%p365_p10) }
  0x1d   : > { %v690_v1 = vld [vmem:[%s1636_s7] sm:$0xf] (!%p365_p10)  ;;  %1215 = vset.pattern.permute.xlu0 (!%p365_p10), %v1329_v8  ;;  %1123 = vmatprep.mubr.msk.f32.mxu1 (!%p365_p10), %vm450_vm2, %v779_v13 }
  0x1e   : > { %s422_s12 = scalar_select %p421_p12, %s1311_s17, 1  ;;  %737 = vperm.xlu1 %1216, %v690_v1   ;;  %716 = vperm.xlu0 %1215, %v690_v1  }
  0x1f   : > { %s424_s25 = scalar_select %p423_p13, %s1307_s16, 1 }
  0x20   : > { %s1065_s30 = sshll.u32 %s422_s12, 1  ;;  %s1557_s17 = scalar_lea.hbm %s1621_s10, %s1088_s15 }
  0x21   : > { %s426_s24 = sadd.s32 %s1065_s30, %s424_s25 }
  0x22   : > { %s1066_s23 = sshll.u32 %s426_s24, 2  ;;  %1217 = vset.pattern.permute.xlu1 %v1328_v3  ;;  %1219 = vset.pattern.permute.xlu0 %v1327_v2 }
  0x23   : > { %s436_s21 = scalar_lea.vmem %s1612_s1, %s1066_s23  ;;  %s428_s28 = scalar_lea.vmem %s1611_s0, %s1066_s23  ;;  %693 = vperm.xlu1 %1217, %v690_v1   ;;  %749 = vperm.xlu0 %1219, %v704_v10  }
  0x24   : > { %v1480_v6 = vld [vmem:[%s436_s21] sm:$0xf]  ;;  %s444_s7 = scalar_lea.vmem %s1613_s2, %s1066_s23  ;;  %s418_s21 = sand.u32 1, %s1299_s14  }
  0x25   : > { %v1482_v7 = vld [vmem:[%s428_s28] sm:$0xf]  ;;  %1107 = vmatpush3.msk.msra.mxu0 %vm454_vm1, %v1480_v6  ;;  %s1064_s22 = sshll.u32 %s418_s21, 6  ;;  %s1559_s16 = scalar_lea.sflag [#allocation3], %s418_s21 }
  0x26   : > { %1109 = vmatmul.mubr.msk.f32.vlgmr.msra.gmra.mrb[0].mxu0 %vm450_vm2, %v449_v5  ;;  %1111 = vmatprep.subr.mxu0 %v1325_v0  ;;  %v1499_v11 = vld [vmem:[%s444_s7] sm:$0xf]  ;;  %s420_s28 = scalar_lea.vmem [#allocation2], %s1064_s22  ;;  %s1330_s23 = smov [#allocation2]  }
  0x27   : > { %1112 = vmatpush3.msk.msra.mxu0 %vm454_vm1, %v1482_v7  ;;  %1113 = vmatprep.mubr.msk.f32.mxu0 %vm1326_vm0, %v1325_v0  ;;  %s942_s7 = sshll.u32 %s420_s28, 4  ;;  %s1233_s25 = sshll.u32 %s1330_s23, 4  ;;  %s1552_s7 = int_to_ptr.vmem [resolvable:$true] %s942_s7  ;;  %s1234_s25 = int_to_ptr.vmem [resolvable:$false] %s1233_s25 }
  0x28   : > { %1116 = vmatprep.subr.mxu0 %v1325_v0  ;;  %1218 = vset.pattern.permute.xlu1 %v1329_v8  ;;  %s1229_s12 = scalar_lea.vmem %s1552_s7, 1024  ;;  %s1235_s29 = scalar_lea.vmem %s1234_s25, 2048 }
  0x29   : > { %728 = vperm.xlu1 %1218, %v704_v10   ;;  %p1230_p0 = scmp.ne.s32.totalorder %s1552_s7, %s1229_s12  ;;  %p1236_p4 = scmp.lt.s32.totalorder %s1552_s7, %s1234_s25 }
  0x2a   : > { %1114 = vmatmul.mubr.msk.f32.vlgmr.msra.gmra.mrb[2].mxu0 %vm450_vm2, %v448_v9  ;;  %p1237_p5 = scmp.lt.s32.totalorder %s1235_s29, %s1229_s12 }
  0x2b   : > { %1117 = vmatpush3.msk.msra.mxu0 %vm454_vm1, %v1499_v11  ;;  %1118 = vmatprep.mubr.msk.f32.mxu0 %vm1326_vm0, %v1325_v0  ;;  %p1231_p1 = pnand %p1230_p0, %p1440_p3 }
  0x2c   : > { %p1238_p6 = por %p1237_p5, %p1236_p4 }
  0x2d   : > { %1220 = vset.pattern.permute.xlu1 %v1328_v3  ;;  %p1232_p2 = pneg %p1231_p1 }
  0x2e   : > { %1119 = vmatmul.mubr.msk.f32.vlgmr.msra.gmra.mrb[4].mxu0 %vm450_vm2, %v604_v12  ;;  %707 = vperm.xlu1 %1220, %v704_v10  }
  0x2f   : > { %p1239_p7 = pnand %p1238_p6, %p1232_p2 }
  0x98   : > { %v686_v20 = vpop.permute.xlu0 %685 }
  0x9d   : > { %v738_v19 = vpop.permute.xlu1 %737  ;;  %v717_v26 = vpop.permute.xlu0 %716 }
  0xa2   : > { %v694_v25 = vpop.permute.xlu1 %693  ;;  %v750_v47 = vpop.permute.xlu0 %749 }
  0xa3   : > { %v755_v55 = vrot.slane %v750_v47, %v712_v46 }
  0xa8   : > { %v729_v39 = vpop.permute.xlu1 %728 }
  0xa9   : > { %v734_v56 = vrot.slane %v729_v39, %v712_v46 }
  0xad   : > { %v708_v51 = vpop.permute.xlu1 %707 }
  0xae   : > { %v713_v59 = vrot.slane %v708_v51, %v712_v46 }
  0xf9   : > { %v524_v14 = vpop.f32.mrb[0].mxu0 }
  0xfa   : > { %v1110_v15 = vpop.f32.mrb[1].mxu0 }
  0xfd   : > { %v600_v16 = vpop.f32.mrb[2].mxu0 }
  0xfe   : > { %v601_v17 = vadd.f32 %v600_v16, %v524_v14  ;;  %v1115_v18 = vpop.f32.mrb[3].mxu0 }
 0x101   : > { %v677_v21 = vpop.f32.mrb[4].mxu0 }
 0x102   : > { %v681_v22 = vadd.f32 %v677_v21, %v601_v17  ;;  %v1120_v23 = vpop.f32.mrb[5].mxu0 }
 0x104   : > { %v688_v24 = vadd.f32 %v686_v20, %v681_v22 }
 0x106   : > { %v689_v27 = vmax.f32 %v688_v24, 0.0 }
 0x108   : > { %v740_v28 = vmul.f32 %v738_v19, %v689_v27  ;;  %v696_v29 = vmul.f32 %v694_v25, %v689_v27  ;;  %v719_v30 = vmul.f32 %v717_v26, %v689_v27  ;;  %v780_v25 = vld [vmem:[%s1620_s9 + $0x8] sm:$0xff]  ;;  %v781_v26 = vld [vmem:[%s1620_s9 + $0x10] sm:$0xff] }
 0x109   : > { %v785_v27 = vld [vmem:[%s1620_s9 + $0x30] sm:$0xff] }
 0x10a   : > { %v741_v32 = vsel %vm454_vm1, %v740_v28, 0.0  ;;  %v697_v33 = vsel %vm454_vm1, %v696_v29, 0.0  ;;  %v720_v34 = vsel %vm454_vm1, %v719_v30, 0.0  ;;  %v786_v28 = vld [vmem:[%s1620_s9 + $0x38] sm:$0xff] }
 0x10b   : > { %v742_v35 = vrot.slane %v741_v32, 4  ;;  %v698_v36 = vrot.slane %v697_v33, 4  ;;  %v721_v37 = vrot.slane %v720_v34, 4 }
 0x10d   : > { %v699_v40 = vadd.f32 %v698_v36, %v697_v33  ;;  %v722_v41 = vadd.f32 %v721_v37, %v720_v34  ;;  %v743_v42 = vadd.f32 %v742_v35, %v741_v32 }
 0x10f   : > { %v700_v43 = vrot.slane %v699_v40, 2  ;;  %v723_v44 = vrot.slane %v722_v41, 2  ;;  %v744_v45 = vrot.slane %v743_v42, 2 }
 0x111   : > { %v701_v48 = vadd.f32 %v700_v43, %v699_v40  ;;  %v724_v49 = vadd.f32 %v723_v44, %v722_v41  ;;  %v745_v50 = vadd.f32 %v744_v45, %v743_v42 }
 0x113   : > { %v725_v52 = vrot.slane %v724_v49, 1  ;;  %v702_v53 = vrot.slane %v701_v48, 1  ;;  %v746_v54 = vrot.slane %v745_v50, 1 }
 0x115   : > { %v726_v57 = vadd.f32 %v725_v52, %v724_v49  ;;  %v703_v58 = vadd.f32 %v702_v53, %v701_v48  ;;  %v747_v60 = vadd.f32 %v746_v54, %v745_v50 }
 0x117   : > { %v735_v61 = vadd.f32 %v734_v56, %v726_v57  ;;  %v756_v62 = vadd.f32 %v755_v55, %v747_v60  ;;  %v714_v63 = vadd.f32 %v713_v59, %v703_v58 }
 0x119   : > { %v757_v0 = vmax.f32 %v735_v61, %v756_v62 }
 0x11b   : > { %v758_v1 = vmax.f32 %v714_v63, %v757_v0 }
 0x11d   : > { %v759_v2 = vsub.f32 %v714_v63, %v758_v1  ;;  %v762_v3 = vsub.f32 %v735_v61, %v758_v1  ;;  %v765_v4 = vsub.f32 %v756_v62, %v758_v1 }
 0x11f   : > { %v760_v5 = vmul.f32 1.442695, %v759_v2  ;;  %v763_v8 = vmul.f32 1.442695, %v762_v3  ;;  %v766_v9 = vmul.f32 1.442695, %v765_v4 }
 0x121   : > { %1221 = vpow2.f32 %v760_v5 }
 0x122   : > { %1223 = vpow2.f32 %v763_v8 }
 0x123   : > { %1225 = vpow2.f32 %v766_v9 }
 0x12b   : > { %v1222_v10 = vpop.eup %1221 }
 0x12c   : > { %v1224_v12 = vpop.eup %1223 }
 0x12d   : > { %v768_v13 = vadd.f32 %v1224_v12, %v1222_v10  ;;  %v1226_v14 = vpop.eup %1225 }
 0x12f   : > { %v769_v15 = vadd.f32 %v1226_v14, %v768_v13 }
 0x131   : > { %1227 = vrcp.f32 %v769_v15 }
 0x13b   : > { %v1228_v16 = vpop.eup %1227 }
 0x13c   : > { %v771_v17 = vmul.f32 %v1228_v16, %v1222_v10  ;;  %v773_v18 = vmul.f32 %v1228_v16, %v1224_v12  ;;  %v776_v19 = vmul.f32 %v1228_v16, %v1226_v14 }
 0x13e   : > { %v772_v20 = vmul.f32 %v771_v17, %v1482_v7  ;;  %v774_v21 = vmul.f32 %v773_v18, %v1480_v6  ;;  %v777_v23 = vmul.f32 %v776_v19, %v1499_v11  ;;  %v782_v6 = vld [vmem:[%s1620_s9 + $0x18] sm:$0xff]  ;;  %v783_v7 = vld [vmem:[%s1620_s9 + $0x20] sm:$0xff]  ;;  %v784_v11 = vld [vmem:[%s1620_s9 + $0x28] sm:$0xff] }
 0x140   : > { %v775_v22 = vadd.f32 %v774_v21, %v772_v20 }
 0x142   : > { %v778_v24 = vadd.f32 %v777_v23, %v775_v22 }
 0x144   : > { %1121 = vmatprep.subr.msk.mxu1 %vm454_vm1, %v778_v24 }
 0x145   : > { %1122 = vmatpush3.msk.msra.mxu1 %vm454_vm1, %v778_v24 }
 0x146   : > { %1124 = vmatmul.mubr.msk.f32.vlgmr.msra.gmra.mrb[0].mxu1 %vm450_vm2, %v780_v25 }
 0x147   : > { %1126 = vmatprep.mubr.msk.f32.mxu1 %vm450_vm2, %v781_v26 }
 0x14a   : > { %1127 = vmatmul.mubr.msk.f32.gmra.mrb[2].mxu1 %vm450_vm2, %v782_v6 }
 0x14b   : > { %1129 = vmatprep.mubr.msk.f32.mxu1 %vm450_vm2, %v783_v7 }
 0x14e   : > { %1130 = vmatmul.mubr.msk.f32.gmra.mrb[4].mxu1 %vm450_vm2, %v784_v11 }
 0x14f   : > { %1132 = vmatprep.mubr.msk.f32.mxu1 %vm450_vm2, %v785_v27 }
 0x152   : > { %1133 = vmatmul.mubr.msk.f32.gmra.mrb[6].mxu1 %vm450_vm2, %v786_v28 }
 0x219   : > { %v1125_v29 = vpop.f32.mrb[0].mxu1 }
 0x21a   : > { %920 = vst [vmem:[%s420_s28 + $0x8] sm:$0xff] %v1125_v29  ;;  %v880_v30 = vpop.f32.mrb[1].mxu1 }
 0x21b   : > { %919 = vst [vmem:[%s420_s28] sm:$0xff] %v880_v30 }
 0x21d   : > { %v1128_v31 = vpop.f32.mrb[2].mxu1 }
 0x21e   : > { %922 = vst [vmem:[%s420_s28 + $0x18] sm:$0xff] %v1128_v31  ;;  %v890_v32 = vpop.f32.mrb[3].mxu1 }
 0x21f   : > { %921 = vst [vmem:[%s420_s28 + $0x10] sm:$0xff] %v890_v32 }
 0x221   : > { %v1131_v33 = vpop.f32.mrb[4].mxu1 }
 0x222   : > { %924 = vst [vmem:[%s420_s28 + $0x28] sm:$0xff] %v1131_v33  ;;  %v900_v34 = vpop.f32.mrb[5].mxu1 }
 0x223   : > { %923 = vst [vmem:[%s420_s28 + $0x20] sm:$0xff] %v900_v34 }
 0x225   : > { %v1134_v35 = vpop.f32.mrb[6].mxu1 }
 0x226   : > { %926 = vst [vmem:[%s420_s28 + $0x38] sm:$0xff] %v1134_v35  ;;  %v910_v36 = vpop.f32.mrb[7].mxu1 }
 0x227   : > { %925 = vst [vmem:[%s420_s28 + $0x30] sm:$0xff] %v910_v36 }
 0x228   : > { %1242 = shalt.err (!%p1239_p7)
}
 0x229   : > { %s1243_s30 = scalar_lea.hbm %s1557_s17, 1024  ;;  %s1247_s28 = scalar_lea.hbm %s1621_s10, 4096 }
 0x22a   : > { %p1244_p9 = scmp.ne.s32.totalorder %s1557_s17, %s1243_s30  ;;  %p1248_p12 = scmp.lt.u32.totalorder %s1557_s17, %s1621_s10 }
 0x22b   : > { %p1249_p13 = scmp.lt.u32.totalorder %s1247_s28, %s1243_s30  ;;  %p1251_p1 = scmp.lt.u32.totalorder %s1243_s30, %s1557_s17 }
 0x22c   : > { %p1245_p10 = pnand %p1244_p9, %p1440_p3 }
 0x22d   : > { %p1250_p0 = por %p1249_p13, %p1248_p12 }
 0x22e   : > { %p1246_p11 = pneg %p1245_p10 }
 0x22f   : > { %p1252_p2 = por %p1251_p1, %p1250_p0 }
 0x231   : > { %p1253_p4 = pnand %p1252_p2, %p1246_p11 }
 0x233   : > { %1256 = shalt.err (!%p1253_p4)
}
 0x234   : > { %s1331_s15 = smov 128   ;;  %s1332_s24 = smov 256  }
 0x235   : > { %s1333_s11 = smov 8  }
 0x236   : > { %1135 = dma.vmem_to_hbm [thread:$0]  (%p1440_p3), %s1552_s7, 1024, %s1557_s17, %s1559_s16, %s1331_s15, %s1332_s24, %s1333_s11  }
 0x237 PF: > { %p1141_p5 = scmp.ge.s32.totalorder %s1323_s20, 2  ;;  %s957_s12 = sand.u32 1, %s1295_s13  }
 0x238   : > { %s958_s23 = scalar_lea.sflag [#allocation3], %s957_s12 }
 0x239   : > { %p1138_p6 = pnand %p1141_p5, %p1449_p8 }
 0x23b   : > { %1290 = dma.done.wait (!%p1138_p6), %s958_s23, 1024  }
 0x23c   : > { %1292 = vsyncadd (!%p1138_p6), %s958_s23, 4294966272  ;;  %s23_s20 = sadd.s32 1, %s1323_s20   ;;  %s1637_s25 = sld [smem:[#allocation5_spill]] }
 0x23d   : > { %p20_p7 = scmp.ge.s32.totalorder %s23_s20, 6   ;;  %s1638_s15 = sld [smem:[#allocation10_spill]] }
 0x23e   : > { %s1639_s16 = sld [smem:[#allocation6_spill]]  ;;  %s1640_s17 = sld [smem:[#allocation7_spill]] }
 0x23f   : > { %s1641_s18 = sld [smem:[#allocation8_spill]]  ;;  %s1642_s19 = sld [smem:[#allocation9_spill]] }
 0x240   : > { %s1643_s13 = smov %s1299_s14  ;;  %22 = sbr.rel (!%p20_p7) target bundleno = 7 (0x7), region = 101 }
 0x242   : > { %s1644_s14 = smov %s1637_s25 }
 0x247   :  { %963 = vsyncpa [#allocation3], 1 }
 0x248   :  { %965 = vsyncpa [#allocation3 + $0x1], 1 }

</bundles_post_ra>
